<compile_context>
chip_gen: v6e
topology: v6e:2x2x1
jax: 0.10.0
libtpu: 0.0.40
codegen_flags: <defaults>
</compile_context>

<pallas_src>
import functools

import jax
import jax.numpy as jnp
import numpy as np
from jax.experimental import pallas as pl
from jax.experimental.pallas import tpu as pltpu

LANE = 128  # all feature dims are packed into one 128-lane tile
# TODO(synk): the single-tile packing assumes every packed feature dim
# (cond+latent+n_pairs, cond_hid+hidden+cond_hid, n_nodes^2) fits in 128 lanes;
# larger configs would need a K/N tiling of the weight slab.


def _cond_decoder_kernel(xin_ref, w_ref, b_ref, adj_ref):
    f32 = jnp.float32
    xin = xin_ref[...]            # (TILE_B, 128): [cond | latent | gdiff | 0-pad]
    bias = b_ref[...]             # (8, 128)

    # fused block-diagonal [cond_layers[0] | latent_layer] matmul + ReLU.
    # The gdiff lanes of xin hit all-zero weight rows, so they don't pollute h0.
    h0 = jnp.maximum(
        jnp.dot(xin, w_ref[0], preferred_element_type=f32) + bias[0:1, :], 0.0)

    # cond_layers[2] + ReLU; output columns are shifted into spare lanes so the
    # result can be packed next to the latent embedding without a concat.
    c2 = jnp.maximum(
        jnp.dot(h0, w_ref[1], preferred_element_type=f32) + bias[1:2, :], 0.0)

    # mlp[0](concat([cond_emb, latent_emb])) + ReLU as ONE matmul on the packed
    # activation h0 + c2 (unused lanes of h0 hit zero weight rows).
    h1 = jnp.maximum(
        jnp.dot(h0 + c2, w_ref[2], preferred_element_type=f32) + bias[2:3, :], 0.0)

    # final linear folded into a single logit-difference channel, written to the
    # same lanes that carry the gumbel-noise difference inside xin, so the noise
    # add is a plain full-width vector add (no lane slicing).
    d = jnp.dot(h1, w_ref[3], preferred_element_type=f32) + bias[3:4, :] + xin

    # hard gumbel-softmax channel 0: 1.0 iff (logit0 + g0) >= (logit1 + g1).
    # Lanes outside the pair window may produce spurious 1s, but they multiply
    # against all-zero scatter rows below and contribute nothing.
    edges = jnp.where(d >= 0.0, 1.0, 0.0)

    # symmetric 0/1 scatter to the lane-dense flat adjacency.  edges and the
    # scatter matrix are exactly 0/1, so the bf16 MXU path is bit-exact (native
    # rate on v6e/v7x); accumulation stays f32.
    adj_ref[...] = jnp.dot(edges.astype(jnp.bfloat16),
                           w_ref[4].astype(jnp.bfloat16),
                           preferred_element_type=f32)


def make_params(key, latent_dim, hidden_dim, n_layers, n_nodes,
                cond_dim=7, cond_hid_dim=5):
    """Deterministic parameter init (PyTorch nn.Linear-style uniform ranges),
    stored in PyTorch convention W: (out, in), b: (out,)."""
    assert n_layers == 3, (
        "Reference forward applies every hidden mlp layer to `emb`; it only "
        "type-checks for n_layers == 3.")
    out_dim = 2 * n_nodes * (n_nodes - 1) // 2

    def linear(k, in_dim, out_d):
        kw, kb = jax.random.split(k)
        bound = 1.0 / np.sqrt(in_dim)
        w = jax.random.uniform(kw, (out_d, in_dim), jnp.float32, -bound, bound)
        b = jax.random.uniform(kb, (out_d,), jnp.float32, -bound, bound)
        return w, b

    ks = jax.random.split(key, 5)
    p = {}
    p["cond1_w"], p["cond1_b"] = linear(ks[0], cond_dim, cond_hid_dim)
    p["cond2_w"], p["cond2_b"] = linear(ks[1], cond_hid_dim, cond_hid_dim)
    p["lat_w"], p["lat_b"] = linear(ks[2], latent_dim, hidden_dim)
    p["mlp0_w"], p["mlp0_b"] = linear(ks[3], hidden_dim + cond_hid_dim, hidden_dim)
    p["mlp1_w"], p["mlp1_b"] = linear(ks[4], hidden_dim, out_dim)
    return p


def prepare_params(params, *, n_nodes):
    """One-time (host-side, numpy) packing of all parameters into a lane-dense
    weight slab W:(5,128,128) and bias slab b:(8,128).  Zero-padding of unused
    weight rows makes every in-kernel matmul padding-safe without slicing."""
    cond1_w = np.asarray(params["cond1_w"], np.float32)   # (cond_hid, cond_dim)
    cond2_w = np.asarray(params["cond2_w"], np.float32)   # (cond_hid, cond_hid)
    lat_w = np.asarray(params["lat_w"], np.float32)       # (hidden, latent)
    mlp0_w = np.asarray(params["mlp0_w"], np.float32)     # (hidden, cond_hid+hidden)
    mlp1_w = np.asarray(params["mlp1_w"], np.float32)     # (2*n_pairs, hidden)

    ch, cd = cond1_w.shape
    hid, ld = lat_w.shape
    n_pairs = n_nodes * (n_nodes - 1) // 2
    g_off = cd + ld                     # gdiff lanes inside xin / d
    c2_off = ch + hid                   # where the cond2 embedding is packed

    assert g_off + n_pairs <= LANE, "cond+latent+n_pairs must fit 128 lanes"
    assert c2_off + ch <= LANE, "cond_hid+hidden+cond_hid must fit 128 lanes"
    assert max(hid, n_nodes * n_nodes) <= LANE, "hidden / n_nodes^2 must fit 128 lanes"

    W = np.zeros((5, LANE, LANE), np.float32)
    b = np.zeros((8, LANE), np.float32)

    # plane 0: fused block-diagonal [cond_layers[0] | latent_layer]
    W[0, :cd, :ch] = cond1_w.T
    W[0, cd:cd + ld, ch:ch + hid] = lat_w.T
    b[0, :ch] = np.asarray(params["cond1_b"])
    b[0, ch:ch + hid] = np.asarray(params["lat_b"])

    # plane 1: cond_layers[2], reads h0's cond lanes, writes column-shifted lanes
    W[1, :ch, c2_off:c2_off + ch] = cond2_w.T
    b[1, c2_off:c2_off + ch] = np.asarray(params["cond2_b"])

    # plane 2: mlp[0] acting on the packed activation h0 + c2  (rows aligned to
    # the latent lanes of h0 and the shifted cond2 lanes; cond1 lanes stay zero)
    wm0 = mlp0_w.T                                         # (cond_hid+hidden, hidden)
    W[2, c2_off:c2_off + ch, :hid] = wm0[:ch]              # cond_emb half
    W[2, ch:ch + hid, :hid] = wm0[ch:]                     # latent_emb half
    b[2, :hid] = np.asarray(params["mlp0_b"])

    # plane 3: final linear as the channel-0 minus channel-1 logit difference,
    # output columns aligned to the gdiff lanes of xin
    wlast = mlp1_w.T                                       # (hidden, 2*n_pairs)
    W[3, :hid, g_off:g_off + n_pairs] = wlast[:, 0::2] - wlast[:, 1::2]
    blast = np.asarray(params["mlp1_b"])
    b[3, g_off:g_off + n_pairs] = blast[0::2] - blast[1::2]

    # plane 4: symmetric one-hot scatter: pair p=(i<j) -> flat (i*n+j) and (j*n+i)
    iu, ju = np.triu_indices(n_nodes, k=1)
    rows = g_off + np.arange(n_pairs)
    W[4, rows, iu * n_nodes + ju] = 1.0
    W[4, rows, ju * n_nodes + iu] = 1.0

    return {"w": jnp.asarray(W), "b": jnp.asarray(b)}


def _round_up(n, m):
    return ((n + m - 1) // m) * m


@functools.partial(jax.jit, static_argnames=("n_nodes",))
def cond_decoder_forward(packed, x, cond, gumbel_noise, *, n_nodes):
    """x: (B, latent_dim), cond: (B, cond_dim), gumbel_noise: (B, n_pairs, 2).
    packed: output of prepare_params.  Returns adj: (B, n_nodes, n_nodes) f32."""
    f32 = jnp.float32
    B = x.shape[0]
    n_pairs = n_nodes * (n_nodes - 1) // 2
    feat = cond.shape[1] + x.shape[1] + n_pairs
    assert feat <= LANE

    tile_b = min(512, _round_up(B, 8))        # multiple of 8; modest footprint
    b_pad = _round_up(B, tile_b)

    # per-call input glue (cheap, shape-only): one packed activation slab
    # [cond | latent | gumbel-diff | 0-pad] -> exactly one input DMA per tile.
    gd = (gumbel_noise[:, :, 0] - gumbel_noise[:, :, 1]).astype(f32)
    xin = jnp.concatenate([cond.astype(f32), x.astype(f32), gd], axis=1)
    xin = jnp.pad(xin, ((0, b_pad - B), (0, LANE - feat)))

    row_spec = pl.BlockSpec((tile_b, LANE), lambda i: (i, 0))
    w_spec = pl.BlockSpec((5, LANE, LANE), lambda i: (0, 0, 0))   # resident weights
    b_spec = pl.BlockSpec((8, LANE), lambda i: (0, 0))            # resident biases

    # VMEM budget: resident params + double-buffered (xin, out) tiles,
    # plus generous headroom for in-kernel temporaries / internal scratch.
    tile_bytes = tile_b * LANE * 4
    param_bytes = 5 * LANE * LANE * 4 + 8 * LANE * 4
    vmem_limit = int(2 * (param_bytes + 2 * tile_bytes) + (8 << 20))

    adj_flat = pl.pallas_call(
        _cond_decoder_kernel,
        grid=(b_pad // tile_b,),
        in_specs=[row_spec, w_spec, b_spec],
        out_specs=row_spec,
        out_shape=jax.ShapeDtypeStruct((b_pad, LANE), f32),
        compiler_params=pltpu.CompilerParams(
            dimension_semantics=("parallel",),      # megacore sharding on v7x
            vmem_limit_bytes=vmem_limit),
    )(xin, packed["w"], packed["b"])

    return adj_flat[:B, :n_nodes * n_nodes].reshape(B, n_nodes, n_nodes)


if __name__ == "__main__":
    # Small, module-consistent shapes.
    B = 2
    latent_dim = 16
    hidden_dim = 32
    n_layers = 3
    n_nodes = 8
    cond_dim = 7
    cond_hid_dim = 5
    n_pairs = n_nodes * (n_nodes - 1) // 2

    key = jax.random.PRNGKey(0)
    kp, kx, kc, kg = jax.random.split(key, 4)

    params = make_params(kp, latent_dim, hidden_dim, n_layers, n_nodes,
                         cond_dim=cond_dim, cond_hid_dim=cond_hid_dim)
    packed = prepare_params(params, n_nodes=n_nodes)   # one-time packing, not per call

    x = jax.random.normal(kx, (B, latent_dim), jnp.float32)
    cond = jax.random.normal(kc, (B, cond_dim), jnp.float32)
    gumbel_noise = jax.random.gumbel(kg, (B, n_pairs, 2), jnp.float32)

    adj = cond_decoder_forward(packed, x, cond, gumbel_noise, n_nodes=n_nodes)
    adj = jax.block_until_ready(adj)

    # structural checks: symmetric, binary, zero diagonal
    assert adj.shape == (B, n_nodes, n_nodes)
    assert adj.dtype == jnp.float32
    assert bool(jnp.all(adj == jnp.swapaxes(adj, 1, 2)))
    assert bool(jnp.all((adj == 0.0) | (adj == 1.0)))
    assert bool(jnp.all(jnp.diagonal(adj, axis1=1, axis2=2) == 0.0))

    # pure-JAX reference mirroring the PyTorch forward (two-channel argmax form)
    ce = jax.nn.relu(cond @ params["cond1_w"].T + params["cond1_b"])
    ce = jax.nn.relu(ce @ params["cond2_w"].T + params["cond2_b"])
    le = jax.nn.relu(x @ params["lat_w"].T + params["lat_b"])
    emb = jnp.concatenate([ce, le], axis=1)
    h = jax.nn.relu(emb @ params["mlp0_w"].T + params["mlp0_b"])
    logits = (h @ params["mlp1_w"].T + params["mlp1_b"]).reshape(B, n_pairs, 2)
    z = logits + gumbel_noise
    ref_edges = (z[:, :, 0] >= z[:, :, 1]).astype(jnp.float32)
    margin = jnp.abs(z[:, :, 0] - z[:, :, 1])

    iu, ju = np.triu_indices(n_nodes, k=1)
    ker_edges = adj[:, iu, ju]
    # compare only where the gumbel decision is not a floating-point near-tie
    decided = margin > 1e-4
    assert bool(jnp.all(jnp.where(decided, ker_edges == ref_edges, True)))

    print("KERNEL_OK")
</pallas_src>

<mosaic_0001>
module attributes {stable_mosaic.version = 11 : i64} {
  func.func @_cond_decoder_kernel(%arg0: i32, %arg1: memref<8x128xf32, #tpu.memory_space<vmem>>, %arg2: memref<5x128x128xf32, #tpu.memory_space<vmem>>, %arg3: memref<8x128xf32, #tpu.memory_space<vmem>>, %arg4: memref<8x128xf32, #tpu.memory_space<vmem>>) attributes {dimension_semantics = [#tpu.dimension_semantics<parallel>], iteration_bounds = array<i64: 1>, scalar_prefetch = 0 : i64, scratch_operands = 0 : i64, tpu.core_type = #tpu.core_type<tc>, window_params = [{transform_indices = @transform_0, window_bounds = array<i64: 8, 128>}, {pipeline_mode = #tpu.pipeline_mode<synchronous>, transform_indices = @transform_1, window_bounds = array<i64: 5, 128, 128>}, {pipeline_mode = #tpu.pipeline_mode<synchronous>, transform_indices = @transform_2, window_bounds = array<i64: 8, 128>}, {transform_indices = @transform_3, window_bounds = array<i64: 8, 128>}]} {
    %c0 = arith.constant 0 : index
    %c0_0 = arith.constant 0 : index
    %0 = vector.load %arg1[%c0, %c0_0] : memref<8x128xf32, #tpu.memory_space<vmem>>, vector<8x128xf32>
    %c0_1 = arith.constant 0 : index
    %c0_2 = arith.constant 0 : index
    %1 = vector.load %arg3[%c0_1, %c0_2] : memref<8x128xf32, #tpu.memory_space<vmem>>, vector<8x128xf32>
    %c0_3 = arith.constant 0 : index
    %c0_4 = arith.constant 0 : index
    %c0_5 = arith.constant 0 : index
    %2 = vector.load %arg2[%c0_3, %c0_4, %c0_5] : memref<5x128x128xf32, #tpu.memory_space<vmem>>, vector<1x128x128xf32>
    %3 = vector.shape_cast %2 : vector<1x128x128xf32> to vector<128x128xf32>
    %cst = arith.constant dense<0.000000e+00> : vector<8x128xf32>
    %4 = tpu.matmul %0, %3, %cst {dimension_numbers = #tpu.dot_dimension_numbers<[1], [0], [0], [1], [0, 0, 1, 1], [], []>} : vector<8x128xf32>, vector<128x128xf32>, vector<8x128xf32> -> vector<8x128xf32>
    %5 = vector.extract_strided_slice %1 {offsets = [0, 0], sizes = [1, 128], strides = [1, 1]} : vector<8x128xf32> to vector<1x128xf32>
    %6 = vector.broadcast %5 : vector<1x128xf32> to vector<8x128xf32>
    %7 = arith.addf %4, %6 : vector<8x128xf32>
    %cst_6 = arith.constant 0.000000e+00 : f32
    %8 = vector.broadcast %cst_6 : f32 to vector<8x128xf32>
    %9 = arith.maximumf %7, %8 : vector<8x128xf32>
    %c1 = arith.constant 1 : index
    %c0_7 = arith.constant 0 : index
    %c0_8 = arith.constant 0 : index
    %10 = vector.load %arg2[%c1, %c0_7, %c0_8] : memref<5x128x128xf32, #tpu.memory_space<vmem>>, vector<1x128x128xf32>
    %11 = vector.shape_cast %10 : vector<1x128x128xf32> to vector<128x128xf32>
    %cst_9 = arith.constant dense<0.000000e+00> : vector<8x128xf32>
    %12 = tpu.matmul %9, %11, %cst_9 {dimension_numbers = #tpu.dot_dimension_numbers<[1], [0], [0], [1], [0, 0, 1, 1], [], []>} : vector<8x128xf32>, vector<128x128xf32>, vector<8x128xf32> -> vector<8x128xf32>
    %13 = vector.extract_strided_slice %1 {offsets = [1, 0], sizes = [1, 128], strides = [1, 1]} : vector<8x128xf32> to vector<1x128xf32>
    %14 = vector.broadcast %13 : vector<1x128xf32> to vector<8x128xf32>
    %15 = arith.addf %12, %14 : vector<8x128xf32>
    %cst_10 = arith.constant 0.000000e+00 : f32
    %16 = vector.broadcast %cst_10 : f32 to vector<8x128xf32>
    %17 = arith.maximumf %15, %16 : vector<8x128xf32>
    %18 = arith.addf %9, %17 : vector<8x128xf32>
    %c2 = arith.constant 2 : index
    %c0_11 = arith.constant 0 : index
    %c0_12 = arith.constant 0 : index
    %19 = vector.load %arg2[%c2, %c0_11, %c0_12] : memref<5x128x128xf32, #tpu.memory_space<vmem>>, vector<1x128x128xf32>
    %20 = vector.shape_cast %19 : vector<1x128x128xf32> to vector<128x128xf32>
    %cst_13 = arith.constant dense<0.000000e+00> : vector<8x128xf32>
    %21 = tpu.matmul %18, %20, %cst_13 {dimension_numbers = #tpu.dot_dimension_numbers<[1], [0], [0], [1], [0, 0, 1, 1], [], []>} : vector<8x128xf32>, vector<128x128xf32>, vector<8x128xf32> -> vector<8x128xf32>
    %22 = vector.extract_strided_slice %1 {offsets = [2, 0], sizes = [1, 128], strides = [1, 1]} : vector<8x128xf32> to vector<1x128xf32>
    %23 = vector.broadcast %22 : vector<1x128xf32> to vector<8x128xf32>
    %24 = arith.addf %21, %23 : vector<8x128xf32>
    %cst_14 = arith.constant 0.000000e+00 : f32
    %25 = vector.broadcast %cst_14 : f32 to vector<8x128xf32>
    %26 = arith.maximumf %24, %25 : vector<8x128xf32>
    %c3 = arith.constant 3 : index
    %c0_15 = arith.constant 0 : index
    %c0_16 = arith.constant 0 : index
    %27 = vector.load %arg2[%c3, %c0_15, %c0_16] : memref<5x128x128xf32, #tpu.memory_space<vmem>>, vector<1x128x128xf32>
    %28 = vector.shape_cast %27 : vector<1x128x128xf32> to vector<128x128xf32>
    %cst_17 = arith.constant dense<0.000000e+00> : vector<8x128xf32>
    %29 = tpu.matmul %26, %28, %cst_17 {dimension_numbers = #tpu.dot_dimension_numbers<[1], [0], [0], [1], [0, 0, 1, 1], [], []>} : vector<8x128xf32>, vector<128x128xf32>, vector<8x128xf32> -> vector<8x128xf32>
    %30 = vector.extract_strided_slice %1 {offsets = [3, 0], sizes = [1, 128], strides = [1, 1]} : vector<8x128xf32> to vector<1x128xf32>
    %31 = vector.broadcast %30 : vector<1x128xf32> to vector<8x128xf32>
    %32 = arith.addf %29, %31 : vector<8x128xf32>
    %33 = arith.addf %32, %0 : vector<8x128xf32>
    %cst_18 = arith.constant 0.000000e+00 : f32
    %34 = vector.broadcast %cst_18 : f32 to vector<8x128xf32>
    %35 = arith.cmpf oge, %33, %34 : vector<8x128xf32>
    %cst_19 = arith.constant 1.000000e+00 : f32
    %cst_20 = arith.constant 0.000000e+00 : f32
    %36 = vector.broadcast %cst_19 : f32 to vector<8x128xf32>
    %37 = vector.broadcast %cst_20 : f32 to vector<8x128xf32>
    %38 = arith.select %35, %36, %37 : vector<8x128xi1>, vector<8x128xf32>
    %39 = arith.truncf %38 : vector<8x128xf32> to vector<8x128xbf16>
    %c4 = arith.constant 4 : index
    %c0_21 = arith.constant 0 : index
    %c0_22 = arith.constant 0 : index
    %40 = vector.load %arg2[%c4, %c0_21, %c0_22] : memref<5x128x128xf32, #tpu.memory_space<vmem>>, vector<1x128x128xf32>
    %41 = vector.shape_cast %40 : vector<1x128x128xf32> to vector<128x128xf32>
    %42 = arith.truncf %41 : vector<128x128xf32> to vector<128x128xbf16>
    %cst_23 = arith.constant dense<0.000000e+00> : vector<8x128xf32>
    %43 = tpu.matmul %39, %42, %cst_23 {dimension_numbers = #tpu.dot_dimension_numbers<[1], [0], [0], [1], [0, 0, 1, 1], [], []>} : vector<8x128xbf16>, vector<128x128xbf16>, vector<8x128xf32> -> vector<8x128xf32>
    %c0_24 = arith.constant 0 : index
    %c0_25 = arith.constant 0 : index
    %44 = vector.load %arg4[%c0_24, %c0_25] : memref<8x128xf32, #tpu.memory_space<vmem>>, vector<8x128xf32>
    tpu.vector_store %arg4[%c0_24, %c0_25], %43 {strides = array<i32>} : memref<8x128xf32, #tpu.memory_space<vmem>>, vector<8x128xf32>,
    return
  }
  func.func @transform_0(%arg0: i32) -> (i32, i32) {
    %c0_i32 = arith.constant 0 : i32
    %c0_i32_0 = arith.constant 0 : i32
    return %arg0, %c0_i32 : i32, i32
  }
  func.func @transform_1(%arg0: i32) -> (i32, i32, i32) {
    %c0_i32 = arith.constant 0 : i32
    %c0_i32_0 = arith.constant 0 : i32
    %c0_i32_1 = arith.constant 0 : i32
    %c0_i32_2 = arith.constant 0 : i32
    return %c0_i32, %c0_i32_0, %c0_i32_1 : i32, i32, i32
  }
  func.func @transform_2(%arg0: i32) -> (i32, i32) {
    %c0_i32 = arith.constant 0 : i32
    %c0_i32_0 = arith.constant 0 : i32
    %c0_i32_1 = arith.constant 0 : i32
    return %c0_i32, %c0_i32_0 : i32, i32
  }
  func.func @transform_3(%arg0: i32) -> (i32, i32) {
    %c0_i32 = arith.constant 0 : i32
    %c0_i32_0 = arith.constant 0 : i32
    return %arg0, %c0_i32 : i32, i32
  }
}

</mosaic_0001>

<bundles_post_ra>
// kernel: cond_decoder_forward.1
= control target key start
LH: loop header
LB: loop body
LE: loop exit
PB: predicated region body
PF: predicated region fallthrough
CT: control target
= control target key end

     0   :  { %8 = vsyncpa [#allocation3], 0  ;;  %s740_s12 = smov [#allocation2]   ;;  %s879_s0 = inlined_call_operand.vmem [shape: f32[8,128], index: 0, kind: input, shape index: {}]   ;;  %s880_s1 = inlined_call_operand.hbm [shape: f32[5,128,128], index: 1, kind: input, shape index: {}]   ;;  %s881_s2 = inlined_call_operand.vmem [shape: f32[8,128], index: 2, kind: input, shape index: {}]   ;;  %s882_s3 = inlined_call_operand.vmem [shape: f32[8,128], index: 3, kind: output, shape index: {}]  }
   0x1   :  { %s16_s13 = sshll.u32 %s740_s12, 4  ;;  %s17_s13 = int_to_ptr.vmem [resolvable:$true] %s16_s13 }
   0x2   :  { %s726_s14 = scalar_lea.vmem %s17_s13, 10240  ;;  %p731_p1 = scmp.lt.s32.totalorder %s17_s13, %s17_s13 }
   0x3   :  { %p727_p0 = scmp.ne.s32.totalorder %s17_s13, %s726_s14  ;;  %p732_p2 = scmp.lt.s32.totalorder %s726_s14, %s726_s14 }
   0x5   :  { %p733_p3 = por %p732_p2, %p731_p1 }
   0x7   :  { %p734_p4 = pnand %p733_p3, %p727_p0 }
   0x9   :  { %737 = shalt.err (!%p734_p4)
}
   0xa   :  { %s741_s15 = smov 128   ;;  %s742_s16 = smov 8  }
   0xb   :  { %22 = dma.hbm_to_vmem [thread:$0]  %s880_s1, 10240, %s17_s13, [#allocation3], %s741_s15, %s741_s15, %s742_s16  }
   0xc   :  { %738 = dma.done.wait [#allocation3], 10240  }
   0xd   :  { %739 = vsyncadd [#allocation3], 4294957056  ;;  %v743_v0 = vmov 0.0   ;;  %vm744_vm0 = vmmov 0   ;;  %v46_v1 = vld [vmem:[#allocation2 + $0x78] sm:$0xff]  ;;  %v45_v2 = vld [vmem:[#allocation2 + $0x70] sm:$0xff]  ;;  %v47_v46 = vlaneseq }
   0xe   :  { %552 = vmatprep.subr.mxu1 %v743_v0  ;;  %584 = vmatprep.mubr.msk.f32.mxu1 %vm744_vm0, %v743_v0  ;;  %v44_v3 = vld [vmem:[#allocation2 + $0x68] sm:$0xff]  ;;  %v43_v4 = vld [vmem:[#allocation2 + $0x60] sm:$0xff]  ;;  %v42_v5 = vld [vmem:[#allocation2 + $0x58] sm:$0xff] }
   0xf   :  { %622 = vmatprep.subr.mxu0 %v743_v0  ;;  %654 = vmatprep.mubr.msk.f32.mxu0 %vm744_vm0, %v743_v0  ;;  %v41_v6 = vld [vmem:[#allocation2 + $0x50] sm:$0xff]  ;;  %v40_v7 = vld [vmem:[#allocation2 + $0x48] sm:$0xff]  ;;  %v39_v8 = vld [vmem:[#allocation2 + $0x40] sm:$0xff]  ;;  %v827_v47 = vshrl.u32 %v47_v46, 7 }
  0x10   :  { %553 = vmatpush3.msra.mxu1 %v46_v1  ;;  %v38_v9 = vld [vmem:[#allocation2 + $0x38] sm:$0xff]  ;;  %v37_v10 = vld [vmem:[#allocation2 + $0x30] sm:$0xff]  ;;  %v36_v11 = vld [vmem:[#allocation2 + $0x28] sm:$0xff] }
  0x11   :  { %554 = vmatprep.subr.mxu1 %v743_v0  ;;  %v35_v12 = vld [vmem:[#allocation2 + $0x20] sm:$0xff]  ;;  %v34_v13 = vld [vmem:[#allocation2 + $0x18] sm:$0xff]  ;;  %v33_v14 = vld [vmem:[#allocation2 + $0x10] sm:$0xff]  ;;  %v49_v48 = vsub.s32 0, %v827_v47 }
  0x12   :  { %555 = vmatpush3.msra.mxu1 %v45_v2  ;;  %v32_v15 = vld [vmem:[#allocation2 + $0x8] sm:$0xff]  ;;  %v31_v16 = vld [vmem:[#allocation2] sm:$0xff]  ;;  %v138_v18 = vld [vmem:[#allocation2 + $0xf8] sm:$0xff] }
  0x13   :  { %556 = vmatprep.subr.mxu1 %v743_v0  ;;  %v792_v17 = vld [vmem:[%s879_s0] sm:$0xff]  ;;  %v137_v19 = vld [vmem:[#allocation2 + $0xf0] sm:$0xff]  ;;  %v136_v20 = vld [vmem:[#allocation2 + $0xe8] sm:$0xff] }
  0x14   :  { %557 = vmatpush3.msra.mxu1 %v44_v3  ;;  %v135_v21 = vld [vmem:[#allocation2 + $0xe0] sm:$0xff]  ;;  %v134_v22 = vld [vmem:[#allocation2 + $0xd8] sm:$0xff]  ;;  %v133_v23 = vld [vmem:[#allocation2 + $0xd0] sm:$0xff] }
  0x15   :  { %558 = vmatprep.subr.mxu1 %v743_v0  ;;  %v132_v24 = vld [vmem:[#allocation2 + $0xc8] sm:$0xff]  ;;  %v131_v25 = vld [vmem:[#allocation2 + $0xc0] sm:$0xff]  ;;  %v130_v26 = vld [vmem:[#allocation2 + $0xb8] sm:$0xff] }
  0x16   :  { %559 = vmatpush3.msra.mxu1 %v43_v4  ;;  %v129_v27 = vld [vmem:[#allocation2 + $0xb0] sm:$0xff]  ;;  %v128_v28 = vld [vmem:[#allocation2 + $0xa8] sm:$0xff]  ;;  %v127_v29 = vld [vmem:[#allocation2 + $0xa0] sm:$0xff] }
  0x17   :  { %560 = vmatprep.subr.mxu1 %v743_v0  ;;  %v126_v30 = vld [vmem:[#allocation2 + $0x98] sm:$0xff]  ;;  %v125_v31 = vld [vmem:[#allocation2 + $0x90] sm:$0xff]  ;;  %v124_v32 = vld [vmem:[#allocation2 + $0x88] sm:$0xff] }
  0x18   :  { %561 = vmatpush3.msra.mxu1 %v42_v5  ;;  %v123_v33 = vld [vmem:[#allocation2 + $0x80] sm:$0xff]  ;;  %v231_v34 = vld [vmem:[#allocation2 + $0x178] sm:$0xff]  ;;  %v230_v35 = vld [vmem:[#allocation2 + $0x170] sm:$0xff] }
  0x19   :  { %562 = vmatprep.subr.mxu1 %v743_v0  ;;  %623 = vmatpush3.msra.mxu0 %v231_v34  ;;  %v229_v36 = vld [vmem:[#allocation2 + $0x168] sm:$0xff]  ;;  %v228_v37 = vld [vmem:[#allocation2 + $0x160] sm:$0xff]  ;;  %v227_v38 = vld [vmem:[#allocation2 + $0x158] sm:$0xff] }
  0x1a   :  { %563 = vmatpush3.msra.mxu1 %v41_v6  ;;  %624 = vmatprep.subr.mxu0 %v743_v0  ;;  %v226_v39 = vld [vmem:[#allocation2 + $0x150] sm:$0xff]  ;;  %v225_v40 = vld [vmem:[#allocation2 + $0x148] sm:$0xff]  ;;  %v224_v41 = vld [vmem:[#allocation2 + $0x140] sm:$0xff] }
  0x1b   :  { %564 = vmatprep.subr.mxu1 %v743_v0  ;;  %625 = vmatpush3.msra.mxu0 %v230_v35  ;;  %v223_v42 = vld [vmem:[#allocation2 + $0x138] sm:$0xff]  ;;  %v222_v43 = vld [vmem:[#allocation2 + $0x130] sm:$0xff]  ;;  %v221_v44 = vld [vmem:[#allocation2 + $0x128] sm:$0xff] }
  0x1c   :  { %565 = vmatpush3.msra.mxu1 %v40_v7  ;;  %626 = vmatprep.subr.mxu0 %v743_v0  ;;  %v220_v45 = vld [vmem:[#allocation2 + $0x120] sm:$0xff]  ;;  %v219_v55 = vld [vmem:[#allocation2 + $0x118] sm:$0xff]  ;;  %v218_v56 = vld [vmem:[#allocation2 + $0x110] sm:$0xff] }
  0x1d   :  { %566 = vmatprep.subr.mxu1 %v743_v0  ;;  %627 = vmatpush3.msra.mxu0 %v229_v36  ;;  %v833_v49 = vld [vmem:[%s881_s2] sm:$0xff]  ;;  %v217_v57 = vld [vmem:[#allocation2 + $0x108] sm:$0xff]  ;;  %v323_v59 = vld [vmem:[#allocation2 + $0x1f8] sm:$0xff] }
  0x1e   :  { %567 = vmatpush3.msra.mxu1 %v39_v8  ;;  %628 = vmatprep.subr.mxu0 %v743_v0  ;;  %v50_v50 = vrot.slane %v833_v49, %v49_v48  ;;  %v216_v58 = vld [vmem:[#allocation2 + $0x100] sm:$0xff]  ;;  %v322_v60 = vld [vmem:[#allocation2 + $0x1f0] sm:$0xff]  ;;  %v321_v61 = vld [vmem:[#allocation2 + $0x1e8] sm:$0xff] }
  0x1f   :  { %568 = vmatprep.subr.mxu1 %v743_v0  ;;  %629 = vmatpush3.msra.mxu0 %v228_v37  ;;  %v320_v62 = vld [vmem:[#allocation2 + $0x1e0] sm:$0xff]  ;;  %v319_v63 = vld [vmem:[#allocation2 + $0x1d8] sm:$0xff]  ;;  %v318_v1 = vld [vmem:[#allocation2 + $0x1d0] sm:$0xff] }
  0x20   :  { %569 = vmatpush3.msra.mxu1 %v38_v9  ;;  %630 = vmatprep.subr.mxu0 %v743_v0  ;;  %v317_v2 = vld [vmem:[#allocation2 + $0x1c8] sm:$0xff]  ;;  %v316_v3 = vld [vmem:[#allocation2 + $0x1c0] sm:$0xff]  ;;  %v315_v4 = vld [vmem:[#allocation2 + $0x1b8] sm:$0xff]  ;;  %v141_v9 = vsub.s32 1, %v827_v47 }
  0x21   :  { %570 = vmatprep.subr.mxu1 %v743_v0  ;;  %631 = vmatpush3.msra.mxu0 %v227_v38  ;;  %v314_v5 = vld [vmem:[#allocation2 + $0x1b0] sm:$0xff]  ;;  %v313_v6 = vld [vmem:[#allocation2 + $0x1a8] sm:$0xff]  ;;  %v312_v7 = vld [vmem:[#allocation2 + $0x1a0] sm:$0xff]  ;;  %v234_v38 = vsub.s32 2, %v827_v47 }
  0x22   :  { %571 = vmatpush3.msra.mxu1 %v37_v10  ;;  %632 = vmatprep.subr.mxu0 %v743_v0  ;;  %v311_v8 = vld [vmem:[#allocation2 + $0x198] sm:$0xff]  ;;  %v142_v10 = vrot.slane %v833_v49, %v141_v9  ;;  %v407_v35 = vld [vmem:[#allocation2 + $0x220] sm:$0xff]  ;;  %v408_v36 = vld [vmem:[#allocation2 + $0x228] sm:$0xff] }
  0x23   :  { %572 = vmatprep.subr.mxu1 %v743_v0  ;;  %633 = vmatpush3.msra.mxu0 %v226_v39  ;;  %v421_v37 = vpack.c.bf16 %v408_v36, %v407_v35  ;;  %v235_v39 = vrot.slane %v833_v49, %v234_v38  ;;  %v403_v48 = vld [vmem:[#allocation2 + $0x200] sm:$0xff] }
  0x24   :  { %573 = vmatpush3.msra.mxu1 %v36_v11  ;;  %634 = vmatprep.subr.mxu0 %v743_v0 }
  0x25   :  { %574 = vmatprep.subr.mxu1 %v743_v0  ;;  %635 = vmatpush3.msra.mxu0 %v225_v40 }
  0x26   :  { %575 = vmatpush3.msra.mxu1 %v35_v12  ;;  %636 = vmatprep.subr.mxu0 %v743_v0 }
  0x27   :  { %576 = vmatprep.subr.mxu1 %v743_v0  ;;  %637 = vmatpush3.msra.mxu0 %v224_v41 }
  0x28   :  { %577 = vmatpush3.msra.mxu1 %v34_v13  ;;  %638 = vmatprep.subr.mxu0 %v743_v0 }
  0x29   :  { %578 = vmatprep.subr.mxu1 %v743_v0  ;;  %639 = vmatpush3.msra.mxu0 %v223_v42 }
  0x2a   :  { %579 = vmatpush3.msra.mxu1 %v33_v14  ;;  %640 = vmatprep.subr.mxu0 %v743_v0 }
  0x2b   :  { %580 = vmatprep.subr.mxu1 %v743_v0  ;;  %641 = vmatpush3.msra.mxu0 %v222_v43 }
  0x2c   :  { %581 = vmatpush3.msra.mxu1 %v32_v15  ;;  %642 = vmatprep.subr.mxu0 %v743_v0 }
  0x2d   :  { %582 = vmatprep.subr.mxu1 %v743_v0  ;;  %643 = vmatpush3.msra.mxu0 %v221_v44  ;;  %v405_v44 = vld [vmem:[#allocation2 + $0x210] sm:$0xff] }
  0x2e   :  { %583 = vmatpush3.msra.mxu1 %v31_v16  ;;  %644 = vmatprep.subr.mxu0 %v743_v0  ;;  %v310_v16 = vld [vmem:[#allocation2 + $0x190] sm:$0xff] }
  0x2f   :  { %585 = vmatmul.mubr.f32.vlgmr.msra.gmra.mxu1 %v792_v17  ;;  %587 = vmatprep.subr.mxu1 %v743_v0 }
  0x30   :  { %588 = vmatpush3.msra.mxu1 %v138_v18  ;;  %619 = vmatprep.mubr.msk.f32.mxu1 %vm744_vm0, %v743_v0  ;;  %v309_v18 = vld [vmem:[#allocation2 + $0x188] sm:$0xff] }
  0x31   :  { %589 = vmatprep.subr.mxu1 %v743_v0  ;;  %645 = vmatpush3.msra.mxu0 %v220_v45  ;;  %v406_v45 = vld [vmem:[#allocation2 + $0x218] sm:$0xff] }
  0x32   :  { %590 = vmatpush3.msra.mxu1 %v137_v19  ;;  %646 = vmatprep.subr.mxu0 %v743_v0  ;;  %v308_v19 = vld [vmem:[#allocation2 + $0x180] sm:$0xff]  ;;  %v420_v46 = vpack.c.bf16 %v406_v45, %v405_v44 }
  0x33   :  { %591 = vmatprep.subr.mxu1 %v743_v0  ;;  %647 = vmatpush3.msra.mxu0 %v219_v55 }
  0x34   :  { %592 = vmatpush3.msra.mxu1 %v136_v20  ;;  %648 = vmatprep.subr.mxu0 %v743_v0  ;;  %v417_v20 = vld [vmem:[#allocation2 + $0x270] sm:$0xff] }
  0x35   :  { %593 = vmatprep.subr.mxu1 %v743_v0  ;;  %649 = vmatpush3.msra.mxu0 %v218_v56 }
  0x36   :  { %594 = vmatpush3.msra.mxu1 %v135_v21  ;;  %650 = vmatprep.subr.mxu0 %v743_v0  ;;  %v418_v21 = vld [vmem:[#allocation2 + $0x278] sm:$0xff] }
  0x37   :  { %595 = vmatprep.subr.mxu1 %v743_v0  ;;  %651 = vmatpush3.msra.mxu0 %v217_v57 }
  0x38   :  { %596 = vmatpush3.msra.mxu1 %v134_v22  ;;  %652 = vmatprep.subr.mxu0 %v743_v0  ;;  %v415_v22 = vld [vmem:[#allocation2 + $0x260] sm:$0xff] }
  0x39   :  { %597 = vmatprep.subr.mxu1 %v743_v0  ;;  %653 = vmatpush3.msra.mxu0 %v216_v58  ;;  %v745_v58 = vmov 1.0|1.0  }
  0x3a   :  { %598 = vmatpush3.msra.mxu1 %v133_v23  ;;  %692 = vmatprep.subr.bf16.mxu0 %v743_v0  ;;  %v426_v23 = vpack.c.bf16 %v418_v21, %v417_v20 }
  0x3b   :  { %599 = vmatprep.subr.mxu1 %v743_v0 }
  0x3c   :  { %600 = vmatpush3.msra.mxu1 %v132_v24  ;;  %v416_v24 = vld [vmem:[#allocation2 + $0x268] sm:$0xff] }
  0x3d   :  { %601 = vmatprep.subr.mxu1 %v743_v0 }
  0x3e   :  { %602 = vmatpush3.msra.mxu1 %v131_v25  ;;  %v425_v25 = vpack.c.bf16 %v416_v24, %v415_v22 }
  0x3f   :  { %603 = vmatprep.subr.mxu1 %v743_v0 }
  0x40   :  { %604 = vmatpush3.msra.mxu1 %v130_v26  ;;  %v413_v26 = vld [vmem:[#allocation2 + $0x250] sm:$0xff] }
  0x41   :  { %605 = vmatprep.subr.mxu1 %v743_v0 }
  0x42   :  { %606 = vmatpush3.msra.mxu1 %v129_v27  ;;  %v414_v27 = vld [vmem:[#allocation2 + $0x258] sm:$0xff] }
  0x43   :  { %607 = vmatprep.subr.mxu1 %v743_v0 }
  0x44   :  { %608 = vmatpush3.msra.mxu1 %v128_v28  ;;  %v424_v28 = vpack.c.bf16 %v414_v27, %v413_v26 }
  0x45   :  { %609 = vmatprep.subr.mxu1 %v743_v0 }
  0x46   :  { %610 = vmatpush3.msra.mxu1 %v127_v29  ;;  %v411_v29 = vld [vmem:[#allocation2 + $0x240] sm:$0xff] }
  0x47   :  { %611 = vmatprep.subr.mxu1 %v743_v0 }
  0x48   :  { %612 = vmatpush3.msra.mxu1 %v126_v30  ;;  %v412_v30 = vld [vmem:[#allocation2 + $0x248] sm:$0xff] }
  0x49   :  { %613 = vmatprep.subr.mxu1 %v743_v0 }
  0x4a   :  { %614 = vmatpush3.msra.mxu1 %v125_v31  ;;  %v423_v31 = vpack.c.bf16 %v412_v30, %v411_v29 }
  0x4b   :  { %615 = vmatprep.subr.mxu1 %v743_v0 }
  0x4c   :  { %616 = vmatpush3.msra.mxu1 %v124_v32  ;;  %v409_v32 = vld [vmem:[#allocation2 + $0x230] sm:$0xff] }
  0x4d   :  { %617 = vmatprep.subr.mxu1 %v743_v0 }
  0x4e   :  { %618 = vmatpush3.msra.mxu1 %v123_v33  ;;  %v410_v33 = vld [vmem:[#allocation2 + $0x238] sm:$0xff] }
  0x4f   :  { %657 = vmatprep.subr.mxu1 %v743_v0  ;;  %v422_v34 = vpack.c.bf16 %v410_v33, %v409_v32 }
  0xef   :  { %v117_v51 = vpop.f32.mrf.mxu1 }
  0xf0   :  { %v836_v52 = vadd.f32 %v117_v51, %v50_v50  ;;  %v404_v50 = vld [vmem:[#allocation2 + $0x208] sm:$0xff] }
  0xf1   :  { %v586_v53 = vpop.f32.mrf.mxu1  ;;  %v419_v51 = vpack.c.bf16 %v404_v50, %v403_v48 }
  0xf2   :  { %v121_v54 = vmax.f32 %v836_v52, 0.0  ;;  %v326_v52 = vsub.s32 3, %v827_v47 }
  0xf4   :  { %620 = vmatmul.mubr.f32.vlgmr.msra.gmra.mxu1 %v121_v54  ;;  %v327_v53 = vrot.slane %v833_v49, %v326_v52 }
  0xf5   :  { %689 = vmatprep.mubr.msk.f32.mxu1 %vm744_vm0, %v743_v0  ;;  %658 = vmatpush3.msra.mxu1 %v323_v59 }
  0xf6   :  { %659 = vmatprep.subr.mxu1 %v743_v0 }
  0xf7   :  { %660 = vmatpush3.msra.mxu1 %v322_v60 }
  0xf8   :  { %661 = vmatprep.subr.mxu1 %v743_v0 }
  0xf9   :  { %662 = vmatpush3.msra.mxu1 %v321_v61 }
  0xfa   :  { %663 = vmatprep.subr.mxu1 %v743_v0 }
  0xfb   :  { %664 = vmatpush3.msra.mxu1 %v320_v62 }
  0xfc   :  { %665 = vmatprep.subr.mxu1 %v743_v0 }
  0xfd   :  { %666 = vmatpush3.msra.mxu1 %v319_v63 }
  0xfe   :  { %667 = vmatprep.subr.mxu1 %v743_v0 }
  0xff   :  { %668 = vmatpush3.msra.mxu1 %v318_v1 }
 0x100   :  { %669 = vmatprep.subr.mxu1 %v743_v0 }
 0x101   :  { %670 = vmatpush3.msra.mxu1 %v317_v2 }
 0x102   :  { %671 = vmatprep.subr.mxu1 %v743_v0 }
 0x103   :  { %672 = vmatpush3.msra.mxu1 %v316_v3 }
 0x104   :  { %673 = vmatprep.subr.mxu1 %v743_v0 }
 0x105   :  { %674 = vmatpush3.msra.mxu1 %v315_v4 }
 0x106   :  { %675 = vmatprep.subr.mxu1 %v743_v0 }
 0x107   :  { %676 = vmatpush3.msra.mxu1 %v314_v5 }
 0x108   :  { %677 = vmatprep.subr.mxu1 %v743_v0 }
 0x109   :  { %678 = vmatpush3.msra.mxu1 %v313_v6 }
 0x10a   :  { %679 = vmatprep.subr.mxu1 %v743_v0 }
 0x10b   :  { %680 = vmatpush3.msra.mxu1 %v312_v7 }
 0x10c   :  { %681 = vmatprep.subr.mxu1 %v743_v0 }
 0x10d   :  { %682 = vmatpush3.msra.mxu1 %v311_v8 }
 0x10e   :  { %683 = vmatprep.subr.mxu1 %v743_v0 }
 0x10f   :  { %684 = vmatpush3.msra.mxu1 %v310_v16 }
 0x110   :  { %685 = vmatprep.subr.mxu1 %v743_v0 }
 0x111   :  { %686 = vmatpush3.msra.mxu1 %v309_v18 }
 0x112   :  { %687 = vmatprep.subr.mxu1 %v743_v0 }
 0x113   :  { %688 = vmatpush3.msra.mxu1 %v308_v19 }
 0x1b4   :  { %v209_v11 = vpop.f32.mrf.mxu1 }
 0x1b5   :  { %v210_v12 = vadd.f32 %v209_v11, %v142_v10 }
 0x1b6   :  { %v621_v13 = vpop.f32.mrf.mxu1 }
 0x1b7   :  { %v213_v14 = vmax.f32 %v210_v12, 0.0 }
 0x1b9   :  { %v214_v15 = vadd.f32 %v213_v14, %v121_v54 }
 0x1bb   :  { %655 = vmatmul.mubr.f32.vlgmr.msra.gmra.mxu0 %v214_v15 }
 0x1bc   :  { %708 = vmatprep.mubr.msk.bf16.mxu0 %vm744_vm0, %v743_v0  ;;  %693 = vmatpush3.bf16.msra.mxu0 %v426_v23 }
 0x1bd   :  { %694 = vmatprep.subr.bf16.mxu0 %v743_v0 }
 0x1c0   :  { %695 = vmatpush3.bf16.msra.mxu0 %v425_v25 }
 0x1c1   :  { %696 = vmatprep.subr.bf16.mxu0 %v743_v0 }
 0x1c4   :  { %697 = vmatpush3.bf16.msra.mxu0 %v424_v28 }
 0x1c5   :  { %698 = vmatprep.subr.bf16.mxu0 %v743_v0 }
 0x1c8   :  { %699 = vmatpush3.bf16.msra.mxu0 %v423_v31 }
 0x1c9   :  { %700 = vmatprep.subr.bf16.mxu0 %v743_v0 }
 0x1cc   :  { %701 = vmatpush3.bf16.msra.mxu0 %v422_v34 }
 0x1cd   :  { %702 = vmatprep.subr.bf16.mxu0 %v743_v0 }
 0x1d0   :  { %703 = vmatpush3.bf16.msra.mxu0 %v421_v37 }
 0x1d1   :  { %704 = vmatprep.subr.bf16.mxu0 %v743_v0 }
 0x1d4   :  { %705 = vmatpush3.bf16.msra.mxu0 %v420_v46 }
 0x1d5   :  { %706 = vmatprep.subr.bf16.mxu0 %v743_v0 }
 0x1d8   :  { %707 = vmatpush3.bf16.msra.mxu0 %v419_v51 }
 0x27b   :  { %v302_v40 = vpop.f32.mrf.mxu0 }
 0x27c   :  { %v303_v41 = vadd.f32 %v302_v40, %v235_v39 }
 0x27d   :  { %v656_v42 = vpop.f32.mrf.mxu0 }
 0x27e   :  { %v306_v43 = vmax.f32 %v303_v41, 0.0 }
 0x280   :  { %690 = vmatmul.mubr.f32.vlgmr.msra.gmra.mxu1 %v306_v43 }
 0x340   :  { %v394_v54 = vpop.f32.mrf.mxu1 }
 0x341   :  { %v395_v55 = vadd.f32 %v394_v54, %v327_v53 }
 0x342   :  { %v691_v56 = vpop.f32.mrf.mxu1 }
 0x343   :  { %v398_v57 = vadd.f32 %v395_v55, %v792_v17 }
 0x345   :  { %vm399_vm1 = vcmp.ge.f32.partialorder %v398_v57, 0.0 }
 0x346   :  { %vm473_vm2 = vmpackc.low %vm399_vm1, %vm399_vm1 }
 0x347   :  { %709 = vmatmul.mubr.msk.bf16.vlgmr.msra.gmra.mxu0 %vm473_vm2, %v745_v58 }
 0x407   :  { %v461_v59 = vpop.f32.mrf.mxu0 }
 0x408   :  { %467 = vst [vmem:[%s882_s3] sm:$0xff] %v461_v59 }
 0x409   :  { %v710_v0 = vpop.f32.mrf.mxu0 }
 0x40b   :  { %v464_v60 = vpop.f32.mrf.mxu0 }
 0x40d   :  { %v711_v61 = vpop.f32.mrf.mxu0 }
 0x40e   :  { %472 = vsyncpa [#allocation3], 1 }

</bundles_post_ra>
